<compile_context>
chip_gen: v5e
topology: v5e:2x2
jax: 0.10.0
libtpu: 0.0.40
codegen_flags: <defaults>
</compile_context>

<pallas_src>
import functools

import jax
import jax.numpy as jnp
from jax.experimental import pallas as pl
from jax.experimental.pallas import tpu as pltpu

D_IN = 256            # fixed by the module (Linear(256, ...))
TILE_N_DEFAULT = 2048 # fc4 column tile: multiple of 256 (v6e/v7x MXU) and of 128 (v5e)
TILE_M_MAX = 256      # row tile cap: fills the v6e/v7x MXU, 2x the v5e MXU rows


def _round_up(x, m):
    return (x + m - 1) // m * m


# --------------------------------- kernels ----------------------------------

def head_kernel(num_age_pad,
                x_ref,              # (tile_m, 256) f32
                wh_ref, bh_ref,     # fused [fc | fc2]: (256, nap+256) bf16, (1, nap+256) f32
                w3_ref, b3_ref,     # fc3: (256, 256) bf16, (1, 256) f32
                age_feat_ref,       # (tile_m, nap) f32
                sub_ref):           # (tile_m, 256) bf16
    """fc & fc2 fused into one lane-dense MXU push, then fc3 and the subtract."""
    x = x_ref[...]
    xb = x.astype(jnp.bfloat16)
    h = jnp.dot(xb, wh_ref[...], preferred_element_type=jnp.float32) + bh_ref[...]
    age_feat_ref[...] = h[:, :num_age_pad].astype(age_feat_ref.dtype)
    age_features = h[:, num_age_pad:]
    age_factors = (jnp.dot(age_features.astype(jnp.bfloat16), w3_ref[...],
                           preferred_element_type=jnp.float32) + b3_ref[...])
    sub_ref[...] = (x - age_factors).astype(sub_ref.dtype)


def fc4_kernel(sub_ref,             # (tile_m, 256) bf16
               w4_ref, b4_ref,      # (256, tile_n) bf16, (1, tile_n) f32
               ident_ref):          # (tile_m, tile_n) f32
    ident_ref[...] = (jnp.dot(sub_ref[...], w4_ref[...],
                              preferred_element_type=jnp.float32)
                      + b4_ref[...]).astype(ident_ref.dtype)


# ------------------------------ param packing -------------------------------

def prepare_params(params, tile_n=TILE_N_DEFAULT):
    """Pack / pad / cast parameters once (weights -> bf16, biases stay f32).

    `params` holds pre-transposed weights (in_features, out_features) and (1, out) biases.
    """
    num_age = params["w"].shape[1]
    num_classes = params["w4"].shape[1]
    num_age_pad = _round_up(num_age, 128)
    tile_n = min(tile_n, _round_up(num_classes, 128))
    nc_pad = _round_up(num_classes, tile_n)

    # Pad the fc head to 128 lanes and fuse with fc2 into one weight matrix.
    w_pad = jnp.zeros((D_IN, num_age_pad), jnp.float32).at[:, :num_age].set(params["w"])
    b_pad = jnp.zeros((1, num_age_pad), jnp.float32).at[:, :num_age].set(params["b"])
    w_head = jnp.concatenate([w_pad, params["w2"]], axis=1).astype(jnp.bfloat16)
    b_head = jnp.concatenate([b_pad, params["b2"]], axis=1)

    # Pad fc4 columns to a multiple of the tile size.
    w4 = jnp.zeros((D_IN, nc_pad), jnp.float32).at[:, :num_classes].set(params["w4"])
    b4 = jnp.zeros((1, nc_pad), jnp.float32).at[:, :num_classes].set(params["b4"])

    return {
        "w_head": w_head, "b_head": b_head,
        "w3": params["w3"].astype(jnp.bfloat16), "b3": params["b3"],
        "w4": w4.astype(jnp.bfloat16), "b4": b4,
        "num_age": num_age, "num_age_pad": num_age_pad,
        "num_classes": num_classes, "nc_pad": nc_pad, "tile_n": tile_n,
    }


# --------------------------------- wrapper -----------------------------------

def age_est_forward(x, prep):
    """x: (B, 256) float32. prep: output of prepare_params()."""
    B = x.shape[0]
    tile_n = prep["tile_n"]
    num_age_pad = prep["num_age_pad"]
    nc_pad = prep["nc_pad"]
    head_n = num_age_pad + D_IN

    tile_m = min(_round_up(B, 8), TILE_M_MAX)
    b_pad = _round_up(B, tile_m)
    if b_pad != B:
        x = jnp.zeros((b_pad, D_IN), x.dtype).at[:B].set(x)

    n_row = b_pad // tile_m
    n_col = nc_pad // tile_n

    # ---- Stage 1: fused [fc | fc2] head, fc3, subtract (tiny, row-tiled) ----
    age_feat_p, sub = pl.pallas_call(
        functools.partial(head_kernel, num_age_pad),
        out_shape=(
            jax.ShapeDtypeStruct((b_pad, num_age_pad), jnp.float32),
            jax.ShapeDtypeStruct((b_pad, D_IN), jnp.bfloat16),
        ),
        grid_spec=pltpu.PrefetchScalarGridSpec(
            num_scalar_prefetch=0,
            grid=(n_row,),
            in_specs=[
                pl.BlockSpec((tile_m, D_IN), lambda i: (i, 0)),     # x rows
                pl.BlockSpec((D_IN, head_n), lambda i: (0, 0)),     # [fc | fc2] (resident)
                pl.BlockSpec((1, head_n), lambda i: (0, 0)),
                pl.BlockSpec((D_IN, D_IN), lambda i: (0, 0)),       # fc3 (resident)
                pl.BlockSpec((1, D_IN), lambda i: (0, 0)),
            ],
            out_specs=(
                pl.BlockSpec((tile_m, num_age_pad), lambda i: (i, 0)),
                pl.BlockSpec((tile_m, D_IN), lambda i: (i, 0)),
            ),
        ),
        compiler_params=pltpu.CompilerParams(
            dimension_semantics=("parallel",),
            vmem_limit_bytes=32 * 1024 * 1024,
        ),
    )(x, prep["w_head"], prep["b_head"], prep["w3"], prep["b3"])

    # ---- Stage 2: fc4 GEMM, 2-D grid (columns outer, rows inner), fully parallel ----
    # Column tiles on the OUTER axis: each (256, tile_n) w4 slab is DMA'd once and
    # reused across all row tiles, so the 5 MiB (at num_classes=10000) bf16 weight
    # stream is paid exactly once regardless of batch.  No carried state -> both
    # axes "parallel" -> shards across the 2 TensorCores on v7x.
    ident_p = pl.pallas_call(
        fc4_kernel,
        out_shape=jax.ShapeDtypeStruct((b_pad, nc_pad), jnp.float32),
        grid_spec=pltpu.PrefetchScalarGridSpec(
            num_scalar_prefetch=0,
            grid=(n_col, n_row),
            in_specs=[
                pl.BlockSpec((tile_m, D_IN), lambda jc, ir: (ir, 0)),   # sub rows (tiny bf16)
                pl.BlockSpec((D_IN, tile_n), lambda jc, ir: (0, jc)),   # w4 column tile
                pl.BlockSpec((1, tile_n), lambda jc, ir: (0, jc)),      # b4 column tile
            ],
            out_specs=pl.BlockSpec((tile_m, tile_n), lambda jc, ir: (ir, jc)),
        ),
        compiler_params=pltpu.CompilerParams(
            dimension_semantics=("parallel", "parallel"),
            vmem_limit_bytes=32 * 1024 * 1024,
        ),
    )(sub, prep["w4"], prep["b4"])

    return age_feat_p[:B, :prep["num_age"]], ident_p[:B, :prep["num_classes"]]


# ------------------------------ test utilities -------------------------------

def init_params(key, num_age=58, num_classes=512):
    """Deterministic synthetic parameters matching the module's shapes.
    Weights stored as (in_features, out_features) == torch weight transposed."""
    keys = jax.random.split(key, 8)
    scale = 1.0 / jnp.sqrt(jnp.float32(D_IN))  # PyTorch Linear default U(-1/sqrt(in), 1/sqrt(in))

    def u(k, shape):
        return jax.random.uniform(k, shape, jnp.float32, -scale, scale)

    return {
        "w2": u(keys[0], (D_IN, D_IN)),          "b2": u(keys[1], (1, D_IN)),
        "w":  u(keys[2], (D_IN, num_age)),       "b":  u(keys[3], (1, num_age)),
        "w3": u(keys[4], (D_IN, D_IN)),          "b3": u(keys[5], (1, D_IN)),
        "w4": u(keys[6], (D_IN, num_classes)),   "b4": u(keys[7], (1, num_classes)),
    }


def reference_forward(x, prep):
    """Pure-JAX reference mirroring the kernel's bf16 weight quantization."""
    f32 = jnp.float32
    xb = x.astype(jnp.bfloat16).astype(f32)
    wh = prep["w_head"].astype(f32)
    w3 = prep["w3"].astype(f32)
    w4 = prep["w4"].astype(f32)
    nap = prep["num_age_pad"]

    h = xb @ wh + prep["b_head"]
    age_feat = h[:, :nap]
    age_features = h[:, nap:]
    age_factors = age_features.astype(jnp.bfloat16).astype(f32) @ w3 + prep["b3"]
    sub = (x - age_factors).astype(jnp.bfloat16).astype(f32)
    ident = sub @ w4 + prep["b4"]
    return age_feat[:, :prep["num_age"]], ident[:, :prep["num_classes"]]


if __name__ == "__main__":
    key = jax.random.PRNGKey(0)
    k_x1, k_x2, k_p = jax.random.split(key, 3)

    num_age, num_classes = 58, 512   # small stand-in for num_classes=10000 (same tiled path)
    params = init_params(k_p, num_age=num_age, num_classes=num_classes)

    # Test 1: small batch; force tile_n=256 so the fc4 column grid has >1 step.
    prep1 = prepare_params(params, tile_n=256)
    x1 = jax.random.normal(k_x1, (8, D_IN), jnp.float32)
    age1, id1 = jax.block_until_ready(age_est_forward(x1, prep1))
    r_age1, r_id1 = reference_forward(x1, prep1)
    assert age1.shape == (8, num_age) and id1.shape == (8, num_classes)
    assert jnp.allclose(age1, r_age1, atol=2e-2, rtol=2e-2)
    assert jnp.allclose(id1, r_id1, atol=2e-2, rtol=2e-2)

    # Test 2: stacked batch (production path): multiple row tiles, default large column tile,
    # fc4 weights DMA'd exactly once and reused across all row tiles.
    prep2 = prepare_params(params)
    x2 = jax.random.normal(k_x2, (512, D_IN), jnp.float32)
    age2, id2 = jax.block_until_ready(age_est_forward(x2, prep2))
    r_age2, r_id2 = reference_forward(x2, prep2)
    assert age2.shape == (512, num_age) and id2.shape == (512, num_classes)
    assert jnp.allclose(age2, r_age2, atol=2e-2, rtol=2e-2)
    assert jnp.allclose(id2, r_id2, atol=2e-2, rtol=2e-2)

    print("KERNEL_OK")
</pallas_src>

<mosaic_0001>
module attributes {stable_mosaic.version = 11 : i64} {
  func.func @head_kernel(%arg0: i32, %arg1: memref<8x256xf32, #tpu.memory_space<vmem>>, %arg2: memref<256x384xbf16, #tpu.memory_space<vmem>>, %arg3: memref<1x384xf32, #tpu.memory_space<vmem>>, %arg4: memref<256x256xbf16, #tpu.memory_space<vmem>>, %arg5: memref<1x256xf32, #tpu.memory_space<vmem>>, %arg6: memref<8x128xf32, #tpu.memory_space<vmem>>, %arg7: memref<8x256xbf16, #tpu.memory_space<vmem>>) attributes {dimension_semantics = [#tpu.dimension_semantics<parallel>], iteration_bounds = array<i64: 1>, scalar_prefetch = 0 : i64, scratch_operands = 0 : i64, tpu.core_type = #tpu.core_type<tc>, window_params = [{transform_indices = @transform_0, window_bounds = array<i64: 8, 256>}, {pipeline_mode = #tpu.pipeline_mode<synchronous>, transform_indices = @transform_1, window_bounds = array<i64: 256, 384>}, {pipeline_mode = #tpu.pipeline_mode<synchronous>, transform_indices = @transform_2, window_bounds = array<i64: 1, 384>}, {pipeline_mode = #tpu.pipeline_mode<synchronous>, transform_indices = @transform_3, window_bounds = array<i64: 256, 256>}, {pipeline_mode = #tpu.pipeline_mode<synchronous>, transform_indices = @transform_4, window_bounds = array<i64: 1, 256>}, {transform_indices = @transform_5, window_bounds = array<i64: 8, 128>}, {transform_indices = @transform_6, window_bounds = array<i64: 8, 256>}]} {
    %c0 = arith.constant 0 : index
    %c0_0 = arith.constant 0 : index
    %0 = vector.load %arg1[%c0, %c0_0] : memref<8x256xf32, #tpu.memory_space<vmem>>, vector<8x256xf32>
    %1 = arith.truncf %0 : vector<8x256xf32> to vector<8x256xbf16>
    %c0_1 = arith.constant 0 : index
    %c0_2 = arith.constant 0 : index
    %2 = vector.load %arg2[%c0_1, %c0_2] : memref<256x384xbf16, #tpu.memory_space<vmem>>, vector<256x384xbf16>
    %cst = arith.constant dense<0.000000e+00> : vector<8x384xf32>
    %3 = tpu.matmul %1, %2, %cst {dimension_numbers = #tpu.dot_dimension_numbers<[1], [0], [0], [1], [0, 0, 1, 1], [], []>} : vector<8x256xbf16>, vector<256x384xbf16>, vector<8x384xf32> -> vector<8x384xf32>
    %c0_3 = arith.constant 0 : index
    %c0_4 = arith.constant 0 : index
    %4 = vector.load %arg3[%c0_3, %c0_4] : memref<1x384xf32, #tpu.memory_space<vmem>>, vector<1x384xf32>
    %5 = vector.broadcast %4 : vector<1x384xf32> to vector<8x384xf32>
    %6 = arith.addf %3, %5 : vector<8x384xf32>
    %7 = vector.extract_strided_slice %6 {offsets = [0, 0], sizes = [8, 128], strides = [1, 1]} : vector<8x384xf32> to vector<8x128xf32>
    %c0_5 = arith.constant 0 : index
    %c0_6 = arith.constant 0 : index
    %8 = vector.load %arg6[%c0_5, %c0_6] : memref<8x128xf32, #tpu.memory_space<vmem>>, vector<8x128xf32>
    tpu.vector_store %arg6[%c0_5, %c0_6], %7 {strides = array<i32>} : memref<8x128xf32, #tpu.memory_space<vmem>>, vector<8x128xf32>,
    %9 = vector.extract_strided_slice %6 {offsets = [0, 128], sizes = [8, 256], strides = [1, 1]} : vector<8x384xf32> to vector<8x256xf32>
    %10 = arith.truncf %9 : vector<8x256xf32> to vector<8x256xbf16>
    %c0_7 = arith.constant 0 : index
    %c0_8 = arith.constant 0 : index
    %11 = vector.load %arg4[%c0_7, %c0_8] : memref<256x256xbf16, #tpu.memory_space<vmem>>, vector<256x256xbf16>
    %cst_9 = arith.constant dense<0.000000e+00> : vector<8x256xf32>
    %12 = tpu.matmul %10, %11, %cst_9 {dimension_numbers = #tpu.dot_dimension_numbers<[1], [0], [0], [1], [0, 0, 1, 1], [], []>} : vector<8x256xbf16>, vector<256x256xbf16>, vector<8x256xf32> -> vector<8x256xf32>
    %c0_10 = arith.constant 0 : index
    %c0_11 = arith.constant 0 : index
    %13 = vector.load %arg5[%c0_10, %c0_11] : memref<1x256xf32, #tpu.memory_space<vmem>>, vector<1x256xf32>
    %14 = vector.broadcast %13 : vector<1x256xf32> to vector<8x256xf32>
    %15 = arith.addf %12, %14 : vector<8x256xf32>
    %16 = arith.subf %0, %15 : vector<8x256xf32>
    %17 = arith.truncf %16 : vector<8x256xf32> to vector<8x256xbf16>
    %c0_12 = arith.constant 0 : index
    %c0_13 = arith.constant 0 : index
    %18 = vector.load %arg7[%c0_12, %c0_13] : memref<8x256xbf16, #tpu.memory_space<vmem>>, vector<8x256xbf16>
    tpu.vector_store %arg7[%c0_12, %c0_13], %17 {strides = array<i32>} : memref<8x256xbf16, #tpu.memory_space<vmem>>, vector<8x256xbf16>,
    return
  }
  func.func @transform_0(%arg0: i32) -> (i32, i32) {
    %c0_i32 = arith.constant 0 : i32
    %c0_i32_0 = arith.constant 0 : i32
    return %arg0, %c0_i32 : i32, i32
  }
  func.func @transform_1(%arg0: i32) -> (i32, i32) {
    %c0_i32 = arith.constant 0 : i32
    %c0_i32_0 = arith.constant 0 : i32
    %c0_i32_1 = arith.constant 0 : i32
    return %c0_i32, %c0_i32_0 : i32, i32
  }
  func.func @transform_2(%arg0: i32) -> (i32, i32) {
    %c0_i32 = arith.constant 0 : i32
    %c0_i32_0 = arith.constant 0 : i32
    %c0_i32_1 = arith.constant 0 : i32
    return %c0_i32, %c0_i32_0 : i32, i32
  }
  func.func @transform_3(%arg0: i32) -> (i32, i32) {
    %c0_i32 = arith.constant 0 : i32
    %c0_i32_0 = arith.constant 0 : i32
    %c0_i32_1 = arith.constant 0 : i32
    return %c0_i32, %c0_i32_0 : i32, i32
  }
  func.func @transform_4(%arg0: i32) -> (i32, i32) {
    %c0_i32 = arith.constant 0 : i32
    %c0_i32_0 = arith.constant 0 : i32
    %c0_i32_1 = arith.constant 0 : i32
    return %c0_i32, %c0_i32_0 : i32, i32
  }
  func.func @transform_5(%arg0: i32) -> (i32, i32) {
    %c0_i32 = arith.constant 0 : i32
    %c0_i32_0 = arith.constant 0 : i32
    return %arg0, %c0_i32 : i32, i32
  }
  func.func @transform_6(%arg0: i32) -> (i32, i32) {
    %c0_i32 = arith.constant 0 : i32
    %c0_i32_0 = arith.constant 0 : i32
    return %arg0, %c0_i32 : i32, i32
  }
}

</mosaic_0001>

<bundles_post_ra>
// kernel: tpu_custom_call.1
= control target key start
LH: loop header
LB: loop body
LE: loop exit
PB: predicated region body
PF: predicated region fallthrough
CT: control target
= control target key end

     0   :  { %12 = vsyncpa [#allocation3], 0  ;;  %s1435_s0 = inlined_call_operand.hbm [shape: f32[8,256], index: 0, kind: input, shape index: {}]   ;;  %s1436_s1 = inlined_call_operand.hbm [shape: bf16[256,384], index: 1, kind: input, shape index: {}]   ;;  %s1437_s2 = inlined_call_operand.hbm [shape: f32[1,384], index: 2, kind: input, shape index: {}]   ;;  %s1438_s3 = inlined_call_operand.hbm [shape: bf16[256,256], index: 3, kind: input, shape index: {}]   ;;  %s1439_s4 = inlined_call_operand.vmem [shape: f32[1,256], index: 4, kind: input, shape index: {}]   ;;  %s1440_s5 = inlined_call_operand.hbm [shape: f32[8,128], index: 5, kind: output, shape index: {0}]   ;;  %s1441_s6 = inlined_call_operand.hbm [shape: bf16[8,256], index: 6, kind: output, shape index: {1}]  }
   0x1   :  { %13 = vsyncpa [#allocation6], 0 }
   0x2   :  { %14 = vsyncpa [#allocation9], 0 }
   0x3   :  { %15 = vsyncpa [#allocation4], 0  ;;  %s32_s23 = sshll.u32 %s1436_s1, 4  ;;  %s33_s23 = int_to_ptr.hbm [resolvable:$true] %s32_s23 }
   0x4   :  { %16 = vsyncpa [#allocation12], 0  ;;  %s1349_s24 = smov [#allocation5]   ;;  %s22_s28 = sshll.u32 %s1435_s0, 4  ;;  %s23_s28 = int_to_ptr.hbm [resolvable:$true] %s22_s28 }
   0x5   :  { %s34_s25 = sshll.u32 %s1349_s24, 4  ;;  %s1350_s29 = smov 192   ;;  %s35_s25 = int_to_ptr.vmem [resolvable:$true] %s34_s25 }
   0x6   :  { %s1351_s30 = smov 12   ;;  %s1352_s7 = smov [#allocation2]  }
   0x7   :  { %40 = dma.hbm_to_vmem [thread:$0]  %s33_s23, 6144, %s35_s25, [#allocation6], %s1350_s29, %s1350_s29, %s1351_s30  }
   0x8   :  { %s24_s8 = sshll.u32 %s1352_s7, 4  ;;  %s46_s11 = sshll.u32 %s1437_s2, 4  ;;  %s25_s8 = int_to_ptr.vmem [resolvable:$true] %s24_s8  ;;  %s47_s11 = int_to_ptr.hbm [resolvable:$true] %s46_s11 }
   0x9   :  { %27 = dma.hbm_to_vmem [thread:$0]  %s23_s28, 256, %s25_s8, [#allocation3]  }
   0xa   :  { %s56_s13 = sshll.u32 %s1438_s3, 4  ;;  %s1353_s14 = smov [#allocation7]   ;;  %s57_s13 = int_to_ptr.hbm [resolvable:$true] %s56_s13 }
   0xb   :  { %s48_s15 = sshll.u32 %s1353_s14, 4  ;;  %s1354_s0 = smov [#allocation8]   ;;  %s49_s15 = int_to_ptr.vmem [resolvable:$true] %s48_s15 }
   0xc   :  { %51 = dma.hbm_to_vmem [thread:$0]  %s47_s11, 48, %s49_s15, [#allocation6]  }
   0xd   :  { %s58_s16 = sshll.u32 %s1354_s0, 4  ;;  %s1355_s17 = smov 128   ;;  %s59_s16 = int_to_ptr.vmem [resolvable:$true] %s58_s16 }
   0xe   :  { %s1356_s18 = smov 8  }
   0xf   :  { %64 = dma.hbm_to_vmem [thread:$0]  %s57_s13, 4096, %s59_s16, [#allocation9], %s1355_s17, %s1355_s17, %s1356_s18  }
  0x10   :  { %1339 = dma.done.wait [#allocation3], 256  }
  0x11   :  { %1340 = vsyncadd [#allocation3], 4294967040 }
  0x12   :  { %1341 = dma.done.wait [#allocation6], 6192  }
  0x13   :  { %1342 = vsyncadd [#allocation6], 4294961104 }
  0x14   :  { %1343 = dma.done.wait [#allocation9], 4096  }
  0x15   :  { %1344 = vsyncadd [#allocation9], 4294963200  ;;  %v871_v0 = vld [vmem:[#allocation5 + $0xa8] sm:$0xf]  ;;  %v1127_v1 = vld [vmem:[#allocation5 + $0xb0] sm:$0xf0] }
  0x16   :  { %v967_v2 = vld [vmem:[#allocation5 + $0x168] sm:$0xf]  ;;  %v872_v3 = vor.u32 %v1127_v1, %v871_v0  ;;  %v1151_v4 = vld [vmem:[#allocation5 + $0x170] sm:$0xf0]  ;;  %v859_v5 = vld [vmem:[#allocation5 + $0x90] sm:$0xf] }
  0x17   :  { %v1124_v6 = vld [vmem:[#allocation5 + $0x98] sm:$0xf0]  ;;  %v968_v7 = vor.u32 %v1151_v4, %v967_v2  ;;  %v955_v8 = vld [vmem:[#allocation5 + $0x150] sm:$0xf]  ;;  %v847_v12 = vld [vmem:[#allocation5 + $0x78] sm:$0xf] }
  0x18   :  { %v1148_v9 = vld [vmem:[#allocation5 + $0x158] sm:$0xf0]  ;;  %415 = vmatpush.bf16.msra.mxu0 %v872_v3  ;;  %v860_v10 = vor.u32 %v1124_v6, %v859_v5  ;;  %v1121_v13 = vld [vmem:[#allocation5 + $0x80] sm:$0xf0]  ;;  %v943_v14 = vld [vmem:[#allocation5 + $0x138] sm:$0xf] }
  0x19   :  { %428 = vmatpush.bf16.msra.mxu1 %v968_v7  ;;  %v956_v11 = vor.u32 %v1148_v9, %v955_v8  ;;  %v1145_v15 = vld [vmem:[#allocation5 + $0x140] sm:$0xf0]  ;;  %v1126_v16 = vld [vmem:[#allocation5 + $0xac] sm:$0xf]  ;;  %v873_v17 = vld [vmem:[#allocation5 + $0xb4] sm:$0xf0]  ;;  %v848_v21 = vor.u32 %v1121_v13, %v847_v12 }
  0x1a   :  { %v876_v18 = vor.u32 %v1126_v16, %v873_v17  ;;  %v1150_v19 = vld [vmem:[#allocation5 + $0x16c] sm:$0xf]  ;;  %v969_v20 = vld [vmem:[#allocation5 + $0x174] sm:$0xf0]  ;;  %v835_v22 = vld [vmem:[#allocation5 + $0x60] sm:$0xf]  ;;  %v944_v25 = vor.u32 %v1145_v15, %v943_v14 }
  0x1b   :  { %v1118_v23 = vld [vmem:[#allocation5 + $0x68] sm:$0xf0]  ;;  %v972_v24 = vor.u32 %v1150_v19, %v969_v20  ;;  %v1123_v26 = vld [vmem:[#allocation5 + $0x94] sm:$0xf]  ;;  %v861_v27 = vld [vmem:[#allocation5 + $0x9c] sm:$0xf0] }
  0x1c   :  { %416 = vmatpush.bf16.msra.mxu0 %v860_v10  ;;  %441 = vmatpush.bf16.msra.mxu2 %v876_v18  ;;  %v1147_v28 = vld [vmem:[#allocation5 + $0x154] sm:$0xf]  ;;  %v931_v29 = vld [vmem:[#allocation5 + $0x120] sm:$0xf]  ;;  %v1142_v30 = vld [vmem:[#allocation5 + $0x128] sm:$0xf0]  ;;  %v864_v31 = vor.u32 %v1123_v26, %v861_v27  ;;  %v836_v35 = vor.u32 %v1118_v23, %v835_v22 }
  0x1d   :  { %429 = vmatpush.bf16.msra.mxu1 %v956_v11  ;;  %454 = vmatpush.bf16.msra.mxu3 %v972_v24  ;;  %v957_v32 = vld [vmem:[#allocation5 + $0x15c] sm:$0xf0]  ;;  %v1120_v34 = vld [vmem:[#allocation5 + $0x7c] sm:$0xf]  ;;  %v849_v36 = vld [vmem:[#allocation5 + $0x84] sm:$0xf0]  ;;  %v932_v39 = vor.u32 %v1142_v30, %v931_v29 }
  0x1e   :  { %v960_v33 = vor.u32 %v1147_v28, %v957_v32  ;;  %v1144_v37 = vld [vmem:[#allocation5 + $0x13c] sm:$0xf]  ;;  %v945_v38 = vld [vmem:[#allocation5 + $0x144] sm:$0xf0]  ;;  %v1115_v41 = vld [vmem:[#allocation5 + $0x50] sm:$0xf0]  ;;  %v852_v43 = vor.u32 %v1120_v34, %v849_v36 }
  0x1f   :  { %v823_v40 = vld [vmem:[#allocation5 + $0x48] sm:$0xf]  ;;  %v1139_v44 = vld [vmem:[#allocation5 + $0x110] sm:$0xf0]  ;;  %v948_v45 = vor.u32 %v1144_v37, %v945_v38  ;;  %v1117_v46 = vld [vmem:[#allocation5 + $0x64] sm:$0xf] }
  0x20   :  { %417 = vmatpush.bf16.msra.mxu0 %v848_v21  ;;  %v919_v42 = vld [vmem:[#allocation5 + $0x108] sm:$0xf]  ;;  %442 = vmatpush.bf16.msra.mxu2 %v864_v31  ;;  %v837_v47 = vld [vmem:[#allocation5 + $0x6c] sm:$0xf0]  ;;  %v1141_v48 = vld [vmem:[#allocation5 + $0x124] sm:$0xf]  ;;  %v824_v50 = vor.u32 %v1115_v41, %v823_v40 }
  0x21   :  { %430 = vmatpush.bf16.msra.mxu1 %v944_v25  ;;  %455 = vmatpush.bf16.msra.mxu3 %v960_v33  ;;  %v933_v49 = vld [vmem:[#allocation5 + $0x12c] sm:$0xf0]  ;;  %v920_v51 = vor.u32 %v1139_v44, %v919_v42  ;;  %v1112_v53 = vld [vmem:[#allocation5 + $0x38] sm:$0xf0]  ;;  %v840_v55 = vor.u32 %v1117_v46, %v837_v47  ;;  %v1114_v58 = vld [vmem:[#allocation5 + $0x4c] sm:$0xf] }
  0x22   :  { %v811_v52 = vld [vmem:[#allocation5 + $0x30] sm:$0xf]  ;;  %v1136_v56 = vld [vmem:[#allocation5 + $0xf8] sm:$0xf0]  ;;  %v936_v57 = vor.u32 %v1141_v48, %v933_v49  ;;  %v825_v59 = vld [vmem:[#allocation5 + $0x54] sm:$0xf0] }
  0x23   :  { %v907_v54 = vld [vmem:[#allocation5 + $0xf0] sm:$0xf]  ;;  %v1138_v60 = vld [vmem:[#allocation5 + $0x10c] sm:$0xf]  ;;  %v921_v61 = vld [vmem:[#allocation5 + $0x114] sm:$0xf0]  ;;  %v812_v62 = vor.u32 %v1112_v53, %v811_v52  ;;  %v828_v3 = vor.u32 %v1114_v58, %v825_v59 }
  0x24   :  { %418 = vmatpush.bf16.msra.mxu0 %v836_v35  ;;  %443 = vmatpush.bf16.msra.mxu2 %v852_v43  ;;  %v908_v63 = vor.u32 %v1136_v56, %v907_v54  ;;  %v799_v0 = vld [vmem:[#allocation5 + $0x18] sm:$0xf]  ;;  %v1109_v1 = vld [vmem:[#allocation5 + $0x20] sm:$0xf0]  ;;  %v924_v5 = vor.u32 %v1138_v60, %v921_v61  ;;  %v1111_v6 = vld [vmem:[#allocation5 + $0x34] sm:$0xf] }
  0x25   :  { %431 = vmatpush.bf16.msra.mxu1 %v932_v39  ;;  %456 = vmatpush.bf16.msra.mxu3 %v948_v45  ;;  %v895_v2 = vld [vmem:[#allocation5 + $0xd8] sm:$0xf]  ;;  %v1133_v4 = vld [vmem:[#allocation5 + $0xe0] sm:$0xf0]  ;;  %v813_v7 = vld [vmem:[#allocation5 + $0x3c] sm:$0xf0]  ;;  %v800_v10 = vor.u32 %v1109_v1, %v799_v0 }
  0x26   :  { %v1135_v8 = vld [vmem:[#allocation5 + $0xf4] sm:$0xf]  ;;  %v909_v9 = vld [vmem:[#allocation5 + $0xfc] sm:$0xf0]  ;;  %v896_v12 = vor.u32 %v1133_v4, %v895_v2  ;;  %v1106_v13 = vld [vmem:[#allocation5 + $0x8] sm:$0xf0]  ;;  %v816_v16 = vor.u32 %v1111_v6, %v813_v7 }
  0x27   :  { %v787_v11 = vld [vmem:[#allocation5] sm:$0xf]  ;;  %v1130_v15 = vld [vmem:[#allocation5 + $0xc8] sm:$0xf0]  ;;  %v879_v17 = vld [vmem:[#allocation5 + $0xb0] sm:$0xf]  ;;  %v912_v20 = vor.u32 %v1135_v8, %v909_v9 }
  0x28   :  { %419 = vmatpush.bf16.msra.mxu0 %v824_v50  ;;  %444 = vmatpush.bf16.msra.mxu2 %v840_v55  ;;  %v883_v14 = vld [vmem:[#allocation5 + $0xc0] sm:$0xf]  ;;  %v1128_v18 = vld [vmem:[#allocation5 + $0xb8] sm:$0xf0]  ;;  %v975_v19 = vld [vmem:[#allocation5 + $0x170] sm:$0xf]  ;;  %v788_v24 = vor.u32 %v1106_v13, %v787_v11 }
  0x29   :  { %432 = vmatpush.bf16.msra.mxu1 %v920_v51  ;;  %457 = vmatpush.bf16.msra.mxu3 %v936_v57  ;;  %v1152_v21 = vld [vmem:[#allocation5 + $0x178] sm:$0xf0]  ;;  %v801_v23 = vld [vmem:[#allocation5 + $0x24] sm:$0xf0]  ;;  %v1406_v25 = vld [vmem:[#allocation2] sm:$0xff]  ;;  %v884_v28 = vor.u32 %v1130_v15, %v883_v14  ;;  %v880_v29 = vor.u32 %v1128_v18, %v879_v17  ;;  %s1357_s2 = smov [#allocation10]  }
  0x2a   :  { %v1108_v22 = vld [vmem:[#allocation5 + $0x1c] sm:$0xf]  ;;  %v897_v27 = vld [vmem:[#allocation5 + $0xe4] sm:$0xf0]  ;;  %v976_v31 = vor.u32 %v1152_v21, %v975_v19  ;;  %v867_v32 = vld [vmem:[#allocation5 + $0x98] sm:$0xf]  ;;  %v1412_v37 = vpack.c.bf16 %v1406_v25, %v1406_v25 }
  0x2b   :  { %v1132_v26 = vld [vmem:[#allocation5 + $0xdc] sm:$0xf]  ;;  %v1125_v33 = vld [vmem:[#allocation5 + $0xa0] sm:$0xf0]  ;;  %v963_v34 = vld [vmem:[#allocation5 + $0x158] sm:$0xf]  ;;  %v804_v35 = vor.u32 %v1108_v22, %v801_v23 }
  0x2c   :  { %420 = vmatpush.bf16.msra.mxu0 %v812_v62  ;;  %445 = vmatpush.bf16.msra.mxu2 %v828_v3  ;;  %v1408_v30 = vld [vmem:[#allocation2 + $0x8] sm:$0xff]  ;;  %v1149_v36 = vld [vmem:[#allocation5 + $0x160] sm:$0xf0]  ;;  %v900_v38 = vor.u32 %v1132_v26, %v897_v27  ;;  %v789_v40 = vld [vmem:[#allocation5 + $0xc] sm:$0xf0]  ;;  %v868_v44 = vor.u32 %v1125_v33, %v867_v32  ;;  %s755_s3 = sshll.u32 %s1357_s2, 4  ;;  %s756_s3 = int_to_ptr.vmem [resolvable:$true] %s755_s3 }
  0x2d   :  { %433 = vmatpush.bf16.msra.mxu1 %v908_v63  ;;  %458 = vmatpush.bf16.msra.mxu3 %v924_v5  ;;  %v1105_v39 = vld [vmem:[#allocation5 + $0x4] sm:$0xf]  ;;  %v1416_v41 = vpack.c.bf16 %v1408_v30, %v1408_v30  ;;  %v885_v43 = vld [vmem:[#allocation5 + $0xcc] sm:$0xf0]  ;;  %v1035_v45 = vld [vmem:[#allocation8 + $0x70] sm:$0xf]  ;;  %v964_v46 = vor.u32 %v1149_v36, %v963_v34 }
  0x2e   :  { %v1129_v42 = vld [vmem:[#allocation5 + $0xc4] sm:$0xf]  ;;  %v855_v47 = vld [vmem:[#allocation5 + $0x80] sm:$0xf]  ;;  %v1122_v48 = vld [vmem:[#allocation5 + $0x88] sm:$0xf0]  ;;  %v792_v49 = vor.u32 %v1105_v39, %v789_v40 }
  0x2f   :  { %v1168_v50 = vld [vmem:[#allocation8 + $0x74] sm:$0xf0]  ;;  %v951_v51 = vld [vmem:[#allocation5 + $0x140] sm:$0xf]  ;;  %v1146_v52 = vld [vmem:[#allocation5 + $0x148] sm:$0xf0]  ;;  %v888_v53 = vor.u32 %v1129_v42, %v885_v43  ;;  %v856_v57 = vor.u32 %v1122_v48, %v855_v47 }
  0x30   :  { %421 = vmatpush.bf16.msra.mxu0 %v800_v10  ;;  %446 = vmatpush.bf16.msra.mxu2 %v816_v16  ;;  %v1036_v54 = vor.u32 %v1168_v50, %v1035_v45  ;;  %v1027_v55 = vld [vmem:[#allocation8 + $0x60] sm:$0xf]  ;;  %v1166_v56 = vld [vmem:[#allocation8 + $0x64] sm:$0xf0]  ;;  %v952_v58 = vor.u32 %v1146_v52, %v951_v51  ;;  %v843_v59 = vld [vmem:[#allocation5 + $0x68] sm:$0xf] }
  0x31   :  { %434 = vmatpush.bf16.msra.mxu1 %v896_v12  ;;  %459 = vmatpush.bf16.msra.mxu3 %v912_v20  ;;  %v1119_v60 = vld [vmem:[#allocation5 + $0x70] sm:$0xf0]  ;;  %v939_v61 = vld [vmem:[#allocation5 + $0x128] sm:$0xf]  ;;  %v1028_v63 = vor.u32 %v1166_v56, %v1027_v55  ;;  %v1164_v1 = vld [vmem:[#allocation8 + $0x54] sm:$0xf0] }
  0x32   :  { %v1143_v62 = vld [vmem:[#allocation5 + $0x130] sm:$0xf0]  ;;  %v844_v2 = vor.u32 %v1119_v60, %v843_v59  ;;  %v831_v4 = vld [vmem:[#allocation5 + $0x50] sm:$0xf]  ;;  %v1116_v5 = vld [vmem:[#allocation5 + $0x58] sm:$0xf0] }
  0x33   :  { %v1019_v0 = vld [vmem:[#allocation8 + $0x50] sm:$0xf]  ;;  %v940_v3 = vor.u32 %v1143_v62, %v939_v61  ;;  %v927_v6 = vld [vmem:[#allocation5 + $0x110] sm:$0xf]  ;;  %v1140_v7 = vld [vmem:[#allocation5 + $0x118] sm:$0xf0]  ;;  %v832_v9 = vor.u32 %v1116_v5, %v831_v4 }
  0x34   :  { %422 = vmatpush.bf16.msra.mxu0 %v788_v24  ;;  %447 = vmatpush.bf16.msra.mxu2 %v804_v35  ;;  %v1020_v8 = vor.u32 %v1164_v1, %v1019_v0  ;;  %v928_v10 = vor.u32 %v1140_v7, %v927_v6  ;;  %v819_v11 = vld [vmem:[#allocation5 + $0x38] sm:$0xf]  ;;  %v1113_v12 = vld [vmem:[#allocation5 + $0x40] sm:$0xf0]  ;;  %v807_v17 = vld [vmem:[#allocation5 + $0x20] sm:$0xf] }
  0x35   :  { %435 = vmatpush.bf16.msra.mxu1 %v884_v28  ;;  %460 = vmatpush.bf16.msra.mxu3 %v900_v38  ;;  %v915_v13 = vld [vmem:[#allocation5 + $0xf8] sm:$0xf]  ;;  %v1137_v14 = vld [vmem:[#allocation5 + $0x100] sm:$0xf0]  ;;  %v820_v15 = vor.u32 %v1113_v12, %v819_v11  ;;  %v1110_v18 = vld [vmem:[#allocation5 + $0x28] sm:$0xf0] }
  0x36   :  { %v916_v16 = vor.u32 %v1137_v14, %v915_v13  ;;  %v903_v19 = vld [vmem:[#allocation5 + $0xe0] sm:$0xf]  ;;  %v1134_v20 = vld [vmem:[#allocation5 + $0xe8] sm:$0xf0]  ;;  %v808_v21 = vor.u32 %v1110_v18, %v807_v17  ;;  %v795_v23 = vld [vmem:[#allocation5 + $0x8] sm:$0xf] }
  0x37   :  { %423 = vmatmul.bf16.vlgmr.msra.gmra.mxu0 %v1412_v37  ;;  %v904_v22 = vor.u32 %v1134_v20, %v903_v19  ;;  %v1107_v24 = vld [vmem:[#allocation5 + $0x10] sm:$0xf0]  ;;  %v891_v26 = vld [vmem:[#allocation5 + $0xc8] sm:$0xf]  ;;  %v1167_v28 = vld [vmem:[#allocation8 + $0x74] sm:$0xf] }
  0x38   :  { %467 = vmatpush.bf16.msrb.mxu0 %v880_v29  ;;  %436 = vmatmul.bf16.vlgmr.msra.gmra.mxu1 %v1416_v41  ;;  %v1131_v27 = vld [vmem:[#allocation5 + $0xd0] sm:$0xf0]  ;;  %v1037_v29 = vld [vmem:[#allocation8 + $0x78] sm:$0xf0]  ;;  %v1165_v34 = vld [vmem:[#allocation8 + $0x64] sm:$0xf] }
  0x39   :  { %480 = vmatpush.bf16.msrb.mxu1 %v976_v31  ;;  %448 = vmatpush.bf16.msra.mxu2 %v792_v49  ;;  %v796_v31 = vor.u32 %v1107_v24, %v795_v23  ;;  %v892_v32 = vor.u32 %v1131_v27, %v891_v26  ;;  %v1040_v33 = vor.u32 %v1167_v28, %v1037_v29  ;;  %v1029_v35 = vld [vmem:[#allocation8 + $0x68] sm:$0xf0]  ;;  %v1163_v38 = vld [vmem:[#allocation8 + $0x54] sm:$0xf]  ;;  %v1021_v39 = vld [vmem:[#allocation8 + $0x58] sm:$0xf0] }
  0x3a   :  { %461 = vmatpush.bf16.msra.mxu3 %v888_v53  ;;  %v1032_v36 = vor.u32 %v1165_v34, %v1029_v35  ;;  %v1024_v40 = vor.u32 %v1163_v38, %v1021_v39  ;;  %v1099_v42 = vld [vmem:[#allocation8 + $0xf0] sm:$0xf]  ;;  %v1184_v43 = vld [vmem:[#allocation8 + $0xf4] sm:$0xf0]  ;;  %v1011_v48 = vld [vmem:[#allocation8 + $0x40] sm:$0xf] }
  0x3b   :  { %v1100_v45 = vor.u32 %v1184_v43, %v1099_v42  ;;  %v1162_v49 = vld [vmem:[#allocation8 + $0x44] sm:$0xf0]  ;;  %v1161_v50 = vld [vmem:[#allocation8 + $0x44] sm:$0xf]  ;;  %v1013_v52 = vld [vmem:[#allocation8 + $0x48] sm:$0xf0] }
  0x3c   :  { %468 = vmatpush.bf16.msrb.mxu0 %v868_v44  ;;  %449 = vmatmul.bf16.vlgmr.msra.gmra.mxu2 %v1412_v37  ;;  %v1183_v44 = vld [vmem:[#allocation8 + $0xf4] sm:$0xf]  ;;  %v1012_v51 = vor.u32 %v1162_v49, %v1011_v48  ;;  %v1091_v53 = vld [vmem:[#allocation8 + $0xe0] sm:$0xf]  ;;  %v1181_v55 = vld [vmem:[#allocation8 + $0xe4] sm:$0xf] }
  0x3d   :  { %481 = vmatpush.bf16.msrb.mxu1 %v964_v46  ;;  %694 = vmatpush.bf16.msrb.mxu2 %v1036_v54  ;;  %v1101_v46 = vld [vmem:[#allocation8 + $0xf8] sm:$0xf0]  ;;  %v1016_v54 = vor.u32 %v1161_v50, %v1013_v52  ;;  %v1093_v56 = vld [vmem:[#allocation8 + $0xe8] sm:$0xf0]  ;;  %v1160_v59 = vld [vmem:[#allocation8 + $0x34] sm:$0xf0] }
  0x3e   :  { %462 = vmatmul.bf16.vlgmr.msra.gmra.mxu3 %v1416_v41  ;;  %v1104_v47 = vor.u32 %v1183_v44, %v1101_v46  ;;  %v1159_v60 = vld [vmem:[#allocation8 + $0x34] sm:$0xf]  ;;  %v1005_v61 = vld [vmem:[#allocation8 + $0x38] sm:$0xf0]  ;;  %v1083_v0 = vld [vmem:[#allocation8 + $0xd0] sm:$0xf] }
  0x3f   :  { %707 = vmatpush.bf16.msrb.mxu3 %v1100_v45  ;;  %v1180_v1 = vld [vmem:[#allocation8 + $0xd4] sm:$0xf0]  ;;  %v1085_v4 = vld [vmem:[#allocation8 + $0xd8] sm:$0xf0]  ;;  %v995_v5 = vld [vmem:[#allocation8 + $0x20] sm:$0xf] }
  0x40   :  { %469 = vmatpush.bf16.msrb.mxu0 %v856_v57  ;;  %v1003_v57 = vld [vmem:[#allocation8 + $0x30] sm:$0xf]  ;;  %v1158_v6 = vld [vmem:[#allocation8 + $0x24] sm:$0xf0]  ;;  %v1177_v13 = vld [vmem:[#allocation8 + $0xc4] sm:$0xf] }
  0x41   :  { %482 = vmatpush.bf16.msrb.mxu1 %v952_v58  ;;  %695 = vmatpush.bf16.msrb.mxu2 %v1028_v63  ;;  %v1096_v58 = vor.u32 %v1181_v55, %v1093_v56  ;;  %v1004_v62 = vor.u32 %v1160_v59, %v1003_v57  ;;  %v1008_v63 = vor.u32 %v1159_v60, %v1005_v61  ;;  %v1178_v12 = vld [vmem:[#allocation8 + $0xc4] sm:$0xf0]  ;;  %v1077_v14 = vld [vmem:[#allocation8 + $0xc8] sm:$0xf0]  ;;  %v987_v17 = vld [vmem:[#allocation8 + $0x10] sm:$0xf] }
  0x42   :  { %v996_v11 = vor.u32 %v1158_v6, %v995_v5  ;;  %v1156_v18 = vld [vmem:[#allocation8 + $0x14] sm:$0xf0]  ;;  %v1080_v19 = vor.u32 %v1177_v13, %v1077_v14  ;;  %v1155_v20 = vld [vmem:[#allocation8 + $0x14] sm:$0xf]  ;;  %v1067_v24 = vld [vmem:[#allocation8 + $0xb0] sm:$0xf] }
  0x43   :  { %v1176_v26 = vld [vmem:[#allocation8 + $0xb4] sm:$0xf0]  ;;  %v1175_v27 = vld [vmem:[#allocation8 + $0xb4] sm:$0xf]  ;;  %v1069_v29 = vld [vmem:[#allocation8 + $0xb8] sm:$0xf0] }
  0x44   :  { %470 = vmatpush.bf16.msrb.mxu0 %v844_v2  ;;  %v1179_v2 = vld [vmem:[#allocation8 + $0xd4] sm:$0xf]  ;;  %v1068_v28 = vor.u32 %v1176_v26, %v1067_v24  ;;  %v1153_v34 = vld [vmem:[#allocation8 + $0x4] sm:$0xf]  ;;  %v981_v35 = vld [vmem:[#allocation8 + $0x8] sm:$0xf0] }
  0x45   :  { %483 = vmatpush.bf16.msrb.mxu1 %v940_v3  ;;  %696 = vmatpush.bf16.msrb.mxu2 %v1020_v8  ;;  %v1084_v3 = vor.u32 %v1180_v1, %v1083_v0  ;;  %v1088_v7 = vor.u32 %v1179_v2, %v1085_v4  ;;  %v1157_v8 = vld [vmem:[#allocation8 + $0x24] sm:$0xf]  ;;  %v1174_v39 = vld [vmem:[#allocation8 + $0xa4] sm:$0xf0]  ;;  %v1061_v42 = vld [vmem:[#allocation8 + $0xa8] sm:$0xf0]  ;;  %v984_v43 = vor.u32 %v1153_v34, %v981_v35 }
  0x46   :  { %v151_v46 = vld [vmem:[#allocation7] sm:$0x7]  ;;  %v1172_v48 = vld [vmem:[#allocation8 + $0x94] sm:$0xf0]  ;;  %v1171_v49 = vld [vmem:[#allocation8 + $0x94] sm:$0xf] }
  0x47   :  { %v153_v52 = vperm.slane %v151_v46, 0  ;;  %v1045_v57 = vld [vmem:[#allocation8 + $0x88] sm:$0xf0]  ;;  %v154_v0 = vperm.slane %v151_v46, 1  ;;  %s757_s21 = sshll.u32 %s1440_s5, 4  ;;  %s1358_s5 = smov [#allocation11]   ;;  %s758_s21 = int_to_ptr.hbm [resolvable:$true] %s757_s21 }
  0x48   :  { %471 = vmatpush.bf16.msrb.mxu0 %v832_v9  ;;  %v997_v9 = vld [vmem:[#allocation8 + $0x28] sm:$0xf0]  ;;  %s766_s24 = sshll.u32 %s1358_s5, 4  ;;  %s768_s27 = sshll.u32 %s1441_s6, 4  ;;  %s767_s24 = int_to_ptr.vmem [resolvable:$true] %s766_s24  ;;  %s769_s27 = int_to_ptr.hbm [resolvable:$true] %s768_s27 }
  0x49   :  { %484 = vmatpush.bf16.msrb.mxu1 %v928_v10  ;;  %697 = vmatpush.bf16.msrb.mxu2 %v1012_v51  ;;  %v1075_v10 = vld [vmem:[#allocation8 + $0xc0] sm:$0xf]  ;;  %v1053_v51 = vld [vmem:[#allocation8 + $0x98] sm:$0xf0] }
  0x4c   :  { %472 = vmatpush.bf16.msrb.mxu0 %v820_v15  ;;  %v1000_v15 = vor.u32 %v1157_v8, %v997_v9  ;;  %v155_v8 = vperm.slane %v151_v46, 2 }
  0x4d   :  { %485 = vmatpush.bf16.msrb.mxu1 %v916_v16  ;;  %698 = vmatpush.bf16.msrb.mxu2 %v1004_v62  ;;  %v1076_v16 = vor.u32 %v1178_v12, %v1075_v10 }
  0x50   :  { %473 = vmatpush.bf16.msrb.mxu0 %v808_v21  ;;  %v989_v21 = vld [vmem:[#allocation8 + $0x18] sm:$0xf0] }
  0x51   :  { %486 = vmatpush.bf16.msrb.mxu1 %v904_v22  ;;  %699 = vmatpush.bf16.msrb.mxu2 %v996_v11  ;;  %v988_v22 = vor.u32 %v1156_v18, %v987_v17  ;;  %v992_v23 = vor.u32 %v1155_v20, %v989_v21 }
  0x54   :  { %474 = vmatpush.bf16.msrb.mxu0 %v796_v31  ;;  %v979_v31 = vld [vmem:[#allocation8] sm:$0xf] }
  0x55   :  { %487 = vmatpush.bf16.msrb.mxu1 %v892_v32  ;;  %v1154_v32 = vld [vmem:[#allocation8 + $0x4] sm:$0xf0]  ;;  %700 = vmatpush.bf16.msrb.mxu2 %v988_v22 }
  0x56   :  { %v980_v38 = vor.u32 %v1154_v32, %v979_v31 }
  0x57   :  { %475 = vmatmul.bf16.vlgmr.msrb.gmra.mxu0 %v1412_v37  ;;  %v1182_v37 = vld [vmem:[#allocation8 + $0xe4] sm:$0xf0] }
  0x58   :  { %720 = vmatpush.bf16.msra.mxu0 %v1040_v33  ;;  %488 = vmatmul.bf16.vlgmr.msrb.gmra.mxu1 %v1416_v41  ;;  %v1092_v41 = vor.u32 %v1182_v37, %v1091_v53  ;;  %v1072_v33 = vor.u32 %v1175_v27, %v1069_v29  ;;  %v1056_v53 = vor.u32 %v1171_v49, %v1053_v51  ;;  %v1043_v37 = vld [vmem:[#allocation8 + $0x80] sm:$0xf] }
  0x59   :  { %733 = vmatpush.bf16.msra.mxu1 %v1104_v47  ;;  %701 = vmatpush.bf16.msrb.mxu2 %v980_v38  ;;  %v1051_v47 = vld [vmem:[#allocation8 + $0x90] sm:$0xf] }
  0x5a   :  { %708 = vmatpush.bf16.msrb.mxu3 %v1092_v41  ;;  %v1052_v50 = vor.u32 %v1172_v48, %v1051_v47  ;;  %v1169_v41 = vld [vmem:[#allocation8 + $0x84] sm:$0xf] }
  0x5b   :  { %v1048_v60 = vor.u32 %v1169_v41, %v1045_v57 }
  0x5c   :  { %721 = vmatpush.bf16.msra.mxu0 %v1032_v36  ;;  %v1059_v36 = vld [vmem:[#allocation8 + $0xa0] sm:$0xf] }
  0x5d   :  { %734 = vmatpush.bf16.msra.mxu1 %v1096_v58  ;;  %v1060_v44 = vor.u32 %v1174_v39, %v1059_v36 }
  0x5e   :  { %709 = vmatpush.bf16.msrb.mxu3 %v1084_v3 }
  0x60   :  { %722 = vmatpush.bf16.msra.mxu0 %v1024_v40  ;;  %v1173_v40 = vld [vmem:[#allocation8 + $0xa4] sm:$0xf] }
  0x61   :  { %735 = vmatpush.bf16.msra.mxu1 %v1088_v7  ;;  %v1064_v45 = vor.u32 %v1173_v40, %v1061_v42 }
  0x62   :  { %710 = vmatpush.bf16.msrb.mxu3 %v1076_v16 }
  0x64   :  { %723 = vmatpush.bf16.msra.mxu0 %v1016_v54  ;;  %v1170_v54 = vld [vmem:[#allocation8 + $0x84] sm:$0xf0] }
  0x65   :  { %736 = vmatpush.bf16.msra.mxu1 %v1080_v19  ;;  %v1044_v56 = vor.u32 %v1170_v54, %v1043_v37  ;;  %v528_v19 = vld [vmem:[%s1439_s4] sm:$0x3] }
  0x66   :  { %711 = vmatpush.bf16.msrb.mxu3 %v1068_v28  ;;  %v531_v20 = vperm.slane %v528_v19, 1  ;;  %v530_v22 = vperm.slane %v528_v19, 0 }
  0x68   :  { %724 = vmatpush.bf16.msra.mxu0 %v1008_v63 }
  0x69   :  { %737 = vmatpush.bf16.msra.mxu1 %v1072_v33 }
  0x6a   :  { %712 = vmatpush.bf16.msrb.mxu3 %v1060_v44 }
  0x6c   :  { %725 = vmatpush.bf16.msra.mxu0 %v1000_v15 }
  0x6d   :  { %738 = vmatpush.bf16.msra.mxu1 %v1064_v45 }
  0x6e   :  { %713 = vmatpush.bf16.msrb.mxu3 %v1052_v50 }
  0x70   :  { %726 = vmatpush.bf16.msra.mxu0 %v992_v23 }
  0x71   :  { %739 = vmatpush.bf16.msra.mxu1 %v1056_v53 }
  0x72   :  { %714 = vmatpush.bf16.msrb.mxu3 %v1044_v56 }
  0x74   :  { %727 = vmatpush.bf16.msra.mxu0 %v984_v43 }
  0x75   :  { %740 = vmatpush.bf16.msra.mxu1 %v1048_v60 }
  0xb4   :  { %v424_v55 = vpop.f32.mrf.mxu0 }
  0xb5   :  { %v425_v58 = vadd.f32 %v424_v55, %v153_v52  ;;  %v437_v59 = vpop.f32.mrf.mxu1 }
  0xb7   :  { %v438_v61 = vadd.f32 %v437_v59, %v425_v58 }
  0xb9   :  { %493 = vst [vmem:[#allocation10] sm:$0xff] %v438_v61 }
  0xba   :  { %760 = dma.vmem_to_hbm [thread:$0]  %s756_s3, 128, %s758_s21, [#allocation4]  }
  0xbc   :  { %v426_v62 = vpop.f32.mrf.mxu0 }
  0xbd   :  { %v439_v63 = vpop.f32.mrf.mxu1 }
  0xbf   :  { %v450_v1 = vpop.f32.mrf.mxu2 }
  0xc0   :  { %v451_v2 = vadd.f32 %v450_v1, %v154_v0 }
  0xc1   :  { %v463_v3 = vpop.f32.mrf.mxu3 }
  0xc2   :  { %v464_v4 = vadd.f32 %v463_v3, %v451_v2 }
  0xc4   :  { %v494_v5 = vpack.c.bf16 %v464_v4, %v464_v4 }
  0xc6   :  { %702 = vmatmul.bf16.vlgmr.msrb.gmra.mxu2 %v494_v5  ;;  %728 = vmatmul.bf16.vlgmr.msra.gmra.mxu0 %v494_v5 }
  0xc7   :  { %v452_v6 = vpop.f32.mrf.mxu2 }
  0xc9   :  { %v465_v7 = vpop.f32.mrf.mxu3 }
  0xd4   :  { %v476_v9 = vpop.f32.mrf.mxu0 }
  0xd5   :  { %v477_v10 = vadd.f32 %v476_v9, %v155_v8  ;;  %v489_v11 = vpop.f32.mrf.mxu1 }
  0xd7   :  { %v490_v12 = vadd.f32 %v489_v11, %v477_v10 }
  0xd9   :  { %v495_v13 = vpack.c.bf16 %v490_v12, %v490_v12 }
  0xdb   :  { %715 = vmatmul.bf16.vlgmr.msrb.gmra.mxu3 %v495_v13  ;;  %741 = vmatmul.bf16.vlgmr.msra.gmra.mxu1 %v495_v13 }
  0xdc   :  { %v478_v14 = vpop.f32.mrf.mxu0 }
  0xdd   :  { %v491_v15 = vpop.f32.mrf.mxu1 }
 0x143   :  { %v729_v16 = vpop.f32.mrf.mxu0 }
 0x144   :  { %v730_v24 = vadd.f32 %v729_v16, %v531_v20 }
 0x149   :  { %v703_v17 = vpop.f32.mrf.mxu2 }
 0x14a   :  { %v704_v26 = vadd.f32 %v703_v17, %v530_v22 }
 0x14b   :  { %v731_v18 = vpop.f32.mrf.mxu0 }
 0x151   :  { %v705_v21 = vpop.f32.mrf.mxu2 }
 0x158   :  { %v742_v23 = vpop.f32.mrf.mxu1 }
 0x159   :  { %v743_v27 = vadd.f32 %v742_v23, %v730_v24 }
 0x15b   :  { %v747_v32 = vsub.f32 %v1408_v30, %v743_v27 }
 0x15e   :  { %v716_v28 = vpop.f32.mrf.mxu3 }
 0x15f   :  { %v717_v29 = vadd.f32 %v716_v28, %v704_v26 }
 0x160   :  { %v744_v31 = vpop.f32.mrf.mxu1 }
 0x161   :  { %v746_v33 = vsub.f32 %v1406_v25, %v717_v29 }
 0x163   :  { %v748_v34 = vpack.c.bf16 %v747_v32, %v746_v33 }
 0x165   :  { %749 = vst [vmem:[#allocation11] sm:$0xff] %v748_v34 }
 0x166   :  { %v718_v35 = vpop.f32.mrf.mxu3  ;;  %771 = dma.vmem_to_hbm [thread:$0]  %s767_s24, 128, %s769_s27, [#allocation12]  }
 0x167   :  { %1345 = dma.done.wait [#allocation4], 128  }
 0x168   :  { %1346 = vsyncadd [#allocation4], 4294967168 }
 0x169   :  { %1347 = dma.done.wait [#allocation12], 128  }
 0x16a   :  { %1348 = vsyncadd [#allocation12], 4294967168 }
 0x16b   :  { %780 = vsyncpa [#allocation3], 1 }
 0x16c   :  { %781 = vsyncpa [#allocation6], 1 }
 0x16d   :  { %782 = vsyncpa [#allocation9], 1 }
 0x16e   :  { %783 = vsyncpa [#allocation4], 1 }
 0x16f   :  { %784 = vsyncpa [#allocation12], 1 }

</bundles_post_ra>
